<compile_context>
chip_gen: v7x
topology: tpu7x:2x2x1
jax: 0.10.0
libtpu: 0.0.40
codegen_flags: <defaults>
</compile_context>

<pallas_src>
import numpy as np
import jax
import jax.numpy as jnp
from jax import lax
from jax.experimental import pallas as pl
from jax.experimental.pallas import tpu as pltpu


def adjust_indices(indices, arr_size1, arr_size2):
    """Python/numpy port of the PyTorch helper (parameter setup, not hot path)."""
    new_indices = []
    for (r, c) in np.asarray(indices).T:
        for i in range(arr_size1):
            for j in range(arr_size2):
                new_indices.append([int(r) * arr_size2 + j,
                                    int(c) * arr_size1 + i])
    return np.array(new_indices, dtype=np.int32).T  # (2, nnz)


def _round_up(x, m):
    return ((x + m - 1) // m) * m


def _build_block_schedule(graph_indices, graph_size2):
    """Sort nonzero blocks by output row block; add bias-only phantom steps for
    row blocks with no edges.  Returns per-step (row, col, weight_block, init)."""
    rows = np.asarray(graph_indices[0])
    cols = np.asarray(graph_indices[1])
    E = rows.shape[0]
    s_row, s_col, s_blk, s_init = [], [], [], []
    for r in range(graph_size2):
        edges_r = [e for e in range(E) if int(rows[e]) == r]
        if not edges_r:
            # phantom step: zero weight block (index E), init writes bias only
            s_row.append(r); s_col.append(0); s_blk.append(E); s_init.append(1)
        else:
            # sort by column block so identical x column tiles are consecutive
            # (Pallas skips the re-DMA when the block index repeats)
            edges_r.sort(key=lambda e: int(cols[e]))
            for k, e in enumerate(edges_r):
                s_row.append(r); s_col.append(int(cols[e])); s_blk.append(e)
                s_init.append(1 if k == 0 else 0)
    return (np.array(s_row, np.int32), np.array(s_col, np.int32),
            np.array(s_blk, np.int32), np.array(s_init, np.int32))


def prepare_sparse_linear(graph_indices, values, bias,
                          graph_size1, graph_size2, arr_size1, arr_size2):
    """One-time parameter/layout preparation (block-transposed, lane-padded)."""
    E = graph_indices.shape[1]
    assert values.shape[0] == E * arr_size1 * arr_size2

    as1_pad = _round_up(arr_size1, 128)
    as2_pad = _round_up(arr_size2, 128)

    s_row, s_col, s_blk, s_init = _build_block_schedule(graph_indices, graph_size2)
    n_steps = s_row.shape[0]

    # Block-transposed weights: adjust_indices puts value[e, i, j] at
    # A[r*as2 + j, c*as1 + i], so the per-edge (A^T) block (c, r) is exactly
    # values.reshape(E, arr_size1, arr_size2)[e].
    wt = jnp.asarray(values, jnp.float32).reshape(E, arr_size1, arr_size2)
    wt = jnp.pad(wt, ((0, 0), (0, as1_pad - arr_size1), (0, as2_pad - arr_size2)))
    wt_all = jnp.concatenate(
        [wt, jnp.zeros((1, as1_pad, as2_pad), jnp.float32)], axis=0)  # [E] = zero block
    wt_sched = wt_all[jnp.asarray(s_blk)]              # (n_steps, as1_pad, as2_pad)

    bias_pad = jnp.pad(jnp.asarray(bias, jnp.float32).reshape(graph_size2, arr_size2),
                       ((0, 0), (0, as2_pad - arr_size2)))
    bias_pad = bias_pad.reshape(1, graph_size2 * as2_pad)  # lane-dense bias row

    return dict(
        graph_size1=graph_size1, graph_size2=graph_size2,
        arr_size1=arr_size1, arr_size2=arr_size2,
        size1=graph_size1 * arr_size1, size2=graph_size2 * arr_size2,
        as1_pad=as1_pad, as2_pad=as2_pad, n_steps=n_steps,
        sched_rows=jnp.asarray(s_row), sched_cols=jnp.asarray(s_col),
        sched_init=jnp.asarray(s_init),
        wt_sched=wt_sched, bias_pad=bias_pad,
    )


def _block_spmm_bias_kernel(rows_ref, cols_ref, init_ref,   # scalar prefetch (SMEM)
                            x_ref, w_ref, b_ref,            # inputs (VMEM)
                            o_ref):                         # output (VMEM)
    s = pl.program_id(1)
    # (bt, as1_pad) @ (as1_pad, as2_pad) -> (bt, as2_pad), f32 accumulate on MXU.
    contrib = jnp.dot(x_ref[...], w_ref[0], preferred_element_type=jnp.float32)
    is_init = init_ref[s] == 1

    @pl.when(is_init)
    def _():
        # First step of this output row block: write bias + contribution.
        o_ref[...] = b_ref[...] + contrib

    @pl.when(jnp.logical_not(is_init))
    def _():
        # Same output row block as previous step: accumulate in resident tile.
        o_ref[...] = o_ref[...] + contrib


def sparse_linear_forward(p, x, *, max_batch_tile=256):
    """x: (B, size1, 1) float32 -> (B, size2, 1) float32."""
    B = x.shape[0]
    assert x.shape[1] == p["size1"]
    g1, g2 = p["graph_size1"], p["graph_size2"]
    as1, as2 = p["arr_size1"], p["arr_size2"]
    as1_pad, as2_pad = p["as1_pad"], p["as2_pad"]

    # Batch tiling: one tile at small B, multiple "parallel" tiles at real B.
    bt = min(_round_up(B, 8), max_batch_tile)
    b_pad = _round_up(B, bt)
    n_bt = b_pad // bt

    # Batch-major activations, zero-padded per column block to lane-dense width.
    # (At real sizes with arr_size1 a multiple of 128 this pad/reshape is a no-op.)
    x3 = x[..., 0].reshape(B, g1, as1)
    x3 = jnp.pad(x3, ((0, b_pad - B), (0, 0), (0, as1_pad - as1)))
    x_pad = x3.reshape(b_pad, g1 * as1_pad)

    grid_spec = pltpu.PrefetchScalarGridSpec(
        num_scalar_prefetch=3,
        grid=(n_bt, p["n_steps"]),
        in_specs=[
            # x: gather only the column block touched by this nonzero block
            pl.BlockSpec((bt, as1_pad),
                         lambda b, s, rows, cols, inits: (b, cols[s])),
            # weight blocks, already in schedule order
            pl.BlockSpec((1, as1_pad, as2_pad),
                         lambda b, s, rows, cols, inits: (s, 0, 0)),
            # lane-dense bias row for the current output row block
            pl.BlockSpec((1, as2_pad),
                         lambda b, s, rows, cols, inits: (0, rows[s])),
        ],
        out_specs=pl.BlockSpec((bt, as2_pad),
                               lambda b, s, rows, cols, inits: (b, rows[s])),
    )

    y_pad = pl.pallas_call(
        _block_spmm_bias_kernel,
        out_shape=jax.ShapeDtypeStruct((b_pad, g2 * as2_pad), jnp.float32),
        grid_spec=grid_spec,
        compiler_params=pltpu.CompilerParams(
            dimension_semantics=("parallel", "arbitrary")),
    )(p["sched_rows"], p["sched_cols"], p["sched_init"],
      x_pad, p["wt_sched"], p["bias_pad"])

    # Strip lane/batch padding: (b_pad, g2*as2_pad) -> (B, size2, 1).
    y = y_pad.reshape(b_pad, g2, as2_pad)[:B, :, :as2].reshape(B, p["size2"])
    return y[..., None]


if __name__ == "__main__":
    # Small deterministic configuration (row block 2 has no edges -> bias-only path).
    graph_size1, graph_size2 = 3, 3
    arr_size1, arr_size2 = 4, 8
    size1 = graph_size1 * arr_size1                # 12
    size2 = graph_size2 * arr_size2                # 24
    batch = 2

    graph_indices = np.array([[0, 1, 0],
                              [0, 2, 1]], dtype=np.int32)     # (2, E)
    adj = adjust_indices(graph_indices, arr_size1, arr_size2)  # (2, nnz)
    nnz = adj.shape[1]

    key = jax.random.PRNGKey(0)
    k_val, k_bias, k_x = jax.random.split(key, 3)

    # Parameters (synthetic init matching the module's distributions:
    # values ~ U[0,1) after torch.nn.init.uniform_, bias ~ U(-1/2, 1/2)).
    values = jax.random.uniform(k_val, (nnz,), dtype=jnp.float32)
    bias = jax.random.uniform(k_bias, (size2,), dtype=jnp.float32,
                              minval=-0.5, maxval=0.5)

    # Input: batched column vectors (B, size1, 1).
    x = jax.random.normal(k_x, (batch, size1, 1), dtype=jnp.float32)

    params = prepare_sparse_linear(graph_indices, values, bias,
                                   graph_size1, graph_size2, arr_size1, arr_size2)
    y = sparse_linear_forward(params, x)
    jax.block_until_ready(y)

    # Pure-JAX dense reference (scatter-add of duplicates, like torch_sparse.spmm).
    rows = jnp.asarray(adj[0])
    cols = jnp.asarray(adj[1])
    a_dense = jnp.zeros((size2, size1), jnp.float32).at[rows, cols].add(values)
    y_ref = jnp.einsum("os,bsk->bok", a_dense, x,
                       precision=lax.Precision.HIGHEST) + bias.reshape(1, size2, 1)

    assert y.shape == (batch, size2, 1)
    np.testing.assert_allclose(np.asarray(y), np.asarray(y_ref),
                               rtol=1e-5, atol=1e-5)

    print("KERNEL_OK")
</pallas_src>

<mosaic_0001>
module attributes {stable_mosaic.version = 11 : i64} {
  func.func @_block_spmm_bias_kernel(%arg0: i32, %arg1: i32, %arg2: memref<4xi32, #tpu.memory_space<smem>>, %arg3: memref<4xi32, #tpu.memory_space<smem>>, %arg4: memref<4xi32, #tpu.memory_space<smem>>, %arg5: memref<8x128xf32, #tpu.memory_space<vmem>>, %arg6: memref<1x128x128xf32, #tpu.memory_space<vmem>>, %arg7: memref<1x128xf32, #tpu.memory_space<vmem>>, %arg8: memref<8x128xf32, #tpu.memory_space<vmem>>) attributes {dimension_semantics = [#tpu.dimension_semantics<parallel>, #tpu.dimension_semantics<arbitrary>], iteration_bounds = array<i64: 1, 4>, scalar_prefetch = 3 : i64, scratch_operands = 0 : i64, tpu.core_type = #tpu.core_type<tc>, window_params = [{transform_indices = @transform_0, window_bounds = array<i64: 8, 128>}, {transform_indices = @transform_1, window_bounds = array<i64: 1, 128, 128>}, {transform_indices = @transform_2, window_bounds = array<i64: 1, 128>}, {transform_indices = @transform_3, window_bounds = array<i64: 8, 128>}]} {
    %c0 = arith.constant 0 : index
    %c0_0 = arith.constant 0 : index
    %0 = vector.load %arg5[%c0, %c0_0] : memref<8x128xf32, #tpu.memory_space<vmem>>, vector<8x128xf32>
    %c0_1 = arith.constant 0 : index
    %c0_2 = arith.constant 0 : index
    %c0_3 = arith.constant 0 : index
    %1 = vector.load %arg6[%c0_1, %c0_2, %c0_3] : memref<1x128x128xf32, #tpu.memory_space<vmem>>, vector<1x128x128xf32>
    %2 = vector.shape_cast %1 : vector<1x128x128xf32> to vector<128x128xf32>
    %cst = arith.constant dense<0.000000e+00> : vector<8x128xf32>
    %3 = tpu.matmul %0, %2, %cst {dimension_numbers = #tpu.dot_dimension_numbers<[1], [0], [0], [1], [0, 0, 1, 1], [], []>} : vector<8x128xf32>, vector<128x128xf32>, vector<8x128xf32> -> vector<8x128xf32>
    %4 = arith.index_cast %arg1 : i32 to index
    %5 = memref.load %arg4[%4] : memref<4xi32, #tpu.memory_space<smem>>
    %c1_i32 = arith.constant 1 : i32
    %6 = arith.cmpi eq, %5, %c1_i32 : i32
    %7 = arith.extui %6 : i1 to i32
    %c0_i32 = arith.constant 0 : i32
    %8 = arith.cmpi ne, %7, %c0_i32 : i32
    scf.if %8 {
      %c0_5 = arith.constant 0 : index
      %c0_6 = arith.constant 0 : index
      %12 = vector.load %arg7[%c0_5, %c0_6] : memref<1x128xf32, #tpu.memory_space<vmem>>, vector<1x128xf32>
      %13 = vector.broadcast %12 : vector<1x128xf32> to vector<8x128xf32>
      %14 = arith.addf %13, %3 : vector<8x128xf32>
      %c0_7 = arith.constant 0 : index
      %c0_8 = arith.constant 0 : index
      %15 = vector.load %arg8[%c0_7, %c0_8] : memref<8x128xf32, #tpu.memory_space<vmem>>, vector<8x128xf32>
      tpu.vector_store %arg8[%c0_7, %c0_8], %14 {strides = array<i32>} : memref<8x128xf32, #tpu.memory_space<vmem>>, vector<8x128xf32>,
    } else {
    }
    %true = arith.constant true
    %9 = arith.xori %6, %true : i1
    %10 = arith.extui %9 : i1 to i32
    %c0_i32_4 = arith.constant 0 : i32
    %11 = arith.cmpi ne, %10, %c0_i32_4 : i32
    scf.if %11 {
      %c0_5 = arith.constant 0 : index
      %c0_6 = arith.constant 0 : index
      %12 = vector.load %arg8[%c0_5, %c0_6] : memref<8x128xf32, #tpu.memory_space<vmem>>, vector<8x128xf32>
      %13 = arith.addf %12, %3 : vector<8x128xf32>
      %c0_7 = arith.constant 0 : index
      %c0_8 = arith.constant 0 : index
      %14 = vector.load %arg8[%c0_7, %c0_8] : memref<8x128xf32, #tpu.memory_space<vmem>>, vector<8x128xf32>
      tpu.vector_store %arg8[%c0_7, %c0_8], %13 {strides = array<i32>} : memref<8x128xf32, #tpu.memory_space<vmem>>, vector<8x128xf32>,
    } else {
    }
    return
  }
  func.func @transform_0(%arg0: i32, %arg1: i32, %arg2: memref<4xi32, #tpu.memory_space<smem>>, %arg3: memref<4xi32, #tpu.memory_space<smem>>, %arg4: memref<4xi32, #tpu.memory_space<smem>>) -> (i32, i32) {
    %0 = arith.index_cast %arg1 : i32 to index
    %1 = memref.load %arg3[%0] : memref<4xi32, #tpu.memory_space<smem>>
    %c0_i32 = arith.constant 0 : i32
    return %arg0, %1 : i32, i32
  }
  func.func @transform_1(%arg0: i32, %arg1: i32, %arg2: memref<4xi32, #tpu.memory_space<smem>>, %arg3: memref<4xi32, #tpu.memory_space<smem>>, %arg4: memref<4xi32, #tpu.memory_space<smem>>) -> (i32, i32, i32) {
    %c0_i32 = arith.constant 0 : i32
    %c0_i32_0 = arith.constant 0 : i32
    %c0_i32_1 = arith.constant 0 : i32
    return %arg1, %c0_i32, %c0_i32_0 : i32, i32, i32
  }
  func.func @transform_2(%arg0: i32, %arg1: i32, %arg2: memref<4xi32, #tpu.memory_space<smem>>, %arg3: memref<4xi32, #tpu.memory_space<smem>>, %arg4: memref<4xi32, #tpu.memory_space<smem>>) -> (i32, i32) {
    %0 = arith.index_cast %arg1 : i32 to index
    %1 = memref.load %arg2[%0] : memref<4xi32, #tpu.memory_space<smem>>
    %c0_i32 = arith.constant 0 : i32
    %c0_i32_0 = arith.constant 0 : i32
    return %c0_i32, %1 : i32, i32
  }
  func.func @transform_3(%arg0: i32, %arg1: i32, %arg2: memref<4xi32, #tpu.memory_space<smem>>, %arg3: memref<4xi32, #tpu.memory_space<smem>>, %arg4: memref<4xi32, #tpu.memory_space<smem>>) -> (i32, i32) {
    %0 = arith.index_cast %arg1 : i32 to index
    %1 = memref.load %arg2[%0] : memref<4xi32, #tpu.memory_space<smem>>
    %c0_i32 = arith.constant 0 : i32
    return %arg0, %1 : i32, i32
  }
}

</mosaic_0001>

<bundles_post_ra>
// kernel: tpu_custom_call.1
= control target key start
LH: loop header
LB: loop body
LE: loop exit
PB: predicated region body
PF: predicated region fallthrough
CT: control target
= control target key end

     0   :  { %s1410_s0 = inlined_call_operand.hbm [shape: s32[4], index: 0, kind: input, shape index: {}]   ;;  %s1411_s3 = inlined_call_operand.hbm [shape: f32[8,384], index: 3, kind: input, shape index: {}]   ;;  %s1412_s4 = inlined_call_operand.hbm [shape: f32[4,128,128], index: 4, kind: input, shape index: {}]   ;;  %s1413_s5 = inlined_call_operand.vmem [shape: f32[1,384], index: 5, kind: input, shape index: {}]   ;;  %s1414_s6 = inlined_call_operand.hbm [shape: f32[8,384], index: 6, kind: output, shape index: {}]   ;;  %s1415_s1 = inlined_call_operand.vmem [shape: s32[4], index: 1, kind: input, shape index: {}]   ;;  %s1416_s2 = inlined_call_operand.vmem [shape: s32[4], index: 2, kind: input, shape index: {}]  }
   0x1   :  { %s752_s23 = scalar_lea.hbm %s1410_s0, 16 }
   0x2   :  { %p753_p0 = scmp.ne.s32.totalorder %s1410_s0, %s752_s23  ;;  %p756_p1 = scmp.lt.u32.totalorder %s752_s23, %s1410_s0 }
   0x4   :  { %p758_p2 = pnand %p756_p1, %p753_p0 }
   0x6   :  { %761 = shalt.err (!%p758_p2)  }
   0x7   :  { %s984_s28 = smov [#allocation3]   ;;  %s13_s9 = sshll.u32 %s1415_s1, 4  ;;  %s14_s9 = int_to_ptr.vmem [resolvable:$true] %s13_s9 }
   0x8   :  { %12 = dma.hbm_to_smem %s1410_s0, 16, %s984_s28, [#allocation2] }
   0x9   :  { %s17_s12 = sshll.u32 %s1416_s2, 4  ;;  %s762_s13 = scalar_lea.vmem %s14_s9, 16  ;;  %s18_s12 = int_to_ptr.vmem [resolvable:$true] %s17_s12 }
   0xa   :  { %p763_p3 = scmp.ne.s32.totalorder %s14_s9, %s762_s13  ;;  %p767_p4 = scmp.lt.s32.totalorder %s14_s9, %s14_s9 }
   0xb   :  { %p768_p5 = scmp.lt.s32.totalorder %s762_s13, %s762_s13 }
   0xd   :  { %p769_p6 = por %p768_p5, %p767_p4 }
   0xf   :  { %p770_p7 = pnand %p769_p6, %p763_p3 }
  0x11   :  { %773 = shalt.err (!%p770_p7)  }
  0x12   :  { %s985_s14 = smov [#allocation4]   ;;  %s774_s0 = scalar_lea.vmem %s18_s12, 16 }
  0x13   :  { %16 = dma.vmem_to_smem %s14_s9, 16, %s985_s14, [#allocation2] }
  0x14   :  { %p775_p8 = scmp.ne.s32.totalorder %s18_s12, %s774_s0  ;;  %p779_p9 = scmp.lt.s32.totalorder %s18_s12, %s18_s12 }
  0x15   :  { %p780_p10 = scmp.lt.s32.totalorder %s774_s0, %s774_s0 }
  0x17   :  { %p781_p11 = por %p780_p10, %p779_p9 }
  0x19   :  { %p782_p12 = pnand %p781_p11, %p775_p8 }
  0x1b   :  { %785 = shalt.err (!%p782_p12)  }
  0x1c   :  { %s986_s1 = smov [#allocation5]  }
  0x1d   :  { %20 = dma.vmem_to_smem %s18_s12, 16, %s986_s1, [#allocation2] }
  0x1e   :  { %922 = dma.done.wait [#allocation2], 48 }
  0x1f   :  { %923 = vsyncadd [#allocation2], 4294967248 }
  0x20   :  { %22 = sfence }
  0x21   :  { %23 = vsyncpa [#allocation7], 0 }
  0x22   :  { %25 = vsyncpa [#allocation7 + $0x1], 0 }
  0x23   :  { %26 = vsyncpa [#allocation10], 0 }
  0x24   :  { %28 = vsyncpa [#allocation10 + $0x1], 0 }
  0x25   :  { %29 = vsyncpa [#allocation8], 0 }
  0x26   :  { %31 = vsyncpa [#allocation8 + $0x1], 0  ;;  %s1048_s2 = smov 0   ;;  %s1050_s15 = smov 0  }
  0x27   :  { %s1052_s16 = smov 0   ;;  %s1054_s17 = smov 0  }
  0x28   :  { %s1056_s18 = smov 0   ;;  %s1058_s19 = smov 0  }
  0x29   :  { %s1060_s20 = smov 0   ;;  %s1062_s21 = smov 0  }
  0x2a   :  { %s1064_s22 = smov 0   ;;  %s1066_s23 = smov 0  }
  0x2b   :  { %s1068_s24 = smov 0   ;;  %s1070_s25 = smov 0  }
  0x2c LB: > { %1425 = sst [smem:[#allocation19_spill]] %s938_s2  ;;  %s526_s26 = sadd.s32 4294967295, %s982_s25   ;;  %s982_s25 = sphi %s1070_s25, %s37_s25   ;;  %s978_s24 = sphi %s1068_s24, %s1461_s24   ;;  %s974_s23 = sphi %s1066_s23, %s1460_s23   ;;  %s970_s22 = sphi %s1064_s22, %s1452_s22   ;;  %s966_s21 = sphi %s1062_s21, %s1459_s21   ;;  %s962_s20 = sphi %s1060_s20, %s1458_s20   ;;  %s958_s19 = sphi %s1058_s19, %s1457_s19   ;;  %s954_s18 = sphi %s1056_s18, %s1456_s18   ;;  %s950_s17 = sphi %s1054_s17, %s1455_s17   ;;  %s946_s16 = sphi %s1052_s16, %s1450_s16   ;;  %s942_s15 = sphi %s1050_s15, %s1454_s15   ;;  %s938_s2 = sphi %s1048_s2, %s1453_s2  }
  0x2d   : > { %1426 = sst [smem:[#allocation20_spill]] %s946_s16  ;;  %s527_s27 = sadd.s32 4294967294, %s982_s25  }
  0x2e   : > { %1427 = sst [smem:[#allocation21_spill]] %s970_s22  ;;  %s46_s28 = sadd.s32 1, %s978_s24 }
  0x2f   : > { %s53_s29 = sld [smem:[#allocation4 + %s978_s24]]  ;;  %p47_p13 = scmp.ge.s32.totalorder %s46_s28, 4 }
  0x30   : > { %s60_s30 = sadd.s32 1, %s970_s22  ;;  %p67_p0 = scmp.ne.s32.totalorder %s970_s22, %s966_s21 }
  0x31   : > { %p1421_p1 = scmp.eq.s32.totalorder %s982_s25, 0  ;;  %s1463_s28 = smov (%p47_p13, %s46_s28), 0 }
  0x32   : > { %p73_p3 = scmp.ne.s32.totalorder %s966_s21, %s962_s20  ;;  %s54_s8 = sld [smem:[#allocation4 + %s1463_s28]] }
  0x33   : > { %p1118_p2 = por %p1421_p1, %p67_p0  ;;  %p1124_p4 = scmp.eq.s32.totalorder %s526_s26, 0 }
  0x34   : > { %s137_s10 = sld [smem:[#allocation3 + %s978_s24]]  ;;  %s144_s13 = sadd.s32 1, %s946_s16 }
  0x35   : > { %s1429_s9 = scalar_select %p1124_p4, 1, 0 }
  0x36   : > { %s138_s11 = sld [smem:[#allocation3 + %s1463_s28]]  ;;  %p1132_p5 = por %p1124_p4, %p73_p3 }
  0x37   : > { %p154_p6 = scmp.ne.s32.totalorder %s946_s16, %s942_s15  ;;  %p155_p7 = scmp.eq.s32.totalorder %s526_s26, 3 }
  0x38   : > { %s1430_s12 = scalar_select %p1132_p5, 1, 0 }
  0x39   : > { %p160_p8 = scmp.ne.s32.totalorder %s942_s15, %s938_s2  ;;  %p161_p9 = scmp.eq.s32.totalorder %s527_s27, 3 }
  0x3a   : > { %p1141_p10 = por %p155_p7, %p154_p6  ;;  %s56_s0 = ssub.s32 %s53_s29, %s54_s8 }
  0x3b   : > { %p1145_p11 = por %p161_p9, %p160_p8  ;;  %p58_p12 = scmp.eq.s32.totalorder %s56_s0, 0 }
  0x3c   : > { %s1431_s14 = scalar_select %p1141_p10, 1, 0 }
  0x3d   : > { %s1432_s1 = scalar_select %p1145_p11, 1, 0 }
  0x3e   : > { %s140_s20 = ssub.s32 %s137_s10, %s138_s11  ;;  %p1420_p0 = scmp.lt.s32.totalorder %s982_s25, 4 }
  0x3f   : > { %p142_p13 = scmp.eq.s32.totalorder %s140_s20, 0  ;;  %s181_s2 = sand.u32 1, %s970_s22  }
  0x40   : > { %s1151_s26 = scalar_select %p58_p12, %s970_s22, %s60_s30  }
  0x41   : > { %s1154_s27 = scalar_select %p142_p13, %s946_s16, %s144_s13  }
  0x42   : > { %1433 = sst [smem:[#allocation22_spill]] %s1151_s26  ;;  %p1161_p3 = pnand %p1420_p0, %p1118_p2 }
  0x43   : > { %1434 = sst [smem:[#allocation23_spill]] %s1154_s27  ;;  %s530_s8 = sshll.u32 %s181_s2, 3 }
  0x44   : > { %s623_s10 = scalar_select %p1118_p2, [#allocation4], [#allocation12] }
  0x45   : > { %s624_s30 = scalar_select %p1118_p2, %s978_s24, 0 }
  0x46   : > { %s1465_s10 = smov (!%p1420_p0, %s623_s10), [#allocation14]  ;;  %s185_s11 = scalar_lea.vmem [#allocation6], %s530_s8 }
  0x47   : > { %s1467_s30 = smov (!%p1420_p0, %s624_s30), 0  ;;  %s195_s13 = sshll.u32 %s185_s11, 4  ;;  %s1175_s13 = int_to_ptr.vmem [resolvable:$true] %s195_s13 }
  0x48   : > { %p535_p6 = scmp.ge.s32.totalorder %s982_s25, 1  ;;  %s186_s0 = sld [smem:[%s1465_s10 + %s1467_s30]] }
  0x49   : > { %p229_p7 = scmp.lt.s32.totalorder %s982_s25, 5  ;;  %s83_s7 = ssub.s32 %s978_s24, %s1463_s28 }
  0x4a   : > { %s86_s26 = sadd.s32 1, %s958_s19  ;;  %p1185_p2 = scmp.eq.s32.totalorder %s83_s7, 0 }
  0x4b   : > { %p1178_p8 = pnand %p535_p6, %p229_p7  ;;  %s182_s10 = scalar_lea.sflag [#allocation7], %s181_s2 }
  0x4c   : > { %p788_p13 = pneg %p1161_p3  ;;  %s791_s16 = scalar_lea.hbm %s1411_s3, 384 }
  0x4d   : > { %s1436_s20 = scalar_select %p1178_p8, 1, 0 }
  0x4e   : > { %s531_s22 = sshll.u32 %s186_s0, 7 }
  0x4f   : > { %s1192_s11 = scalar_lea.hbm %s1411_s3, %s531_s22 }
  0x50   : > { %s786_s30 = scalar_lea.hbm %s1192_s11, 128  ;;  %p792_p0 = scmp.lt.u32.totalorder %s1192_s11, %s1411_s3 }
  0x51   : > { %p787_p12 = scmp.ne.s32.totalorder %s1192_s11, %s786_s30  ;;  %p793_p1 = scmp.lt.u32.totalorder %s791_s16, %s786_s30 }
  0x52   : > { %p795_p9 = scmp.lt.u32.totalorder %s786_s30, %s1192_s11 }
  0x53   : > { %p789_p6 = pnand %p788_p13, %p787_p12  ;;  %p794_p11 = por %p793_p1, %p792_p0 }
  0x55   : > { %p790_p7 = pneg %p789_p6  ;;  %p796_p10 = por %p795_p9, %p794_p11 }
  0x57   : > { %p797_p5 = pnand %p796_p10, %p790_p7 }
  0x59   : > { %800 = shalt.err (!%p797_p5)
}
  0x5a   : > { %s801_s2 = scalar_lea.vmem %s1175_s13, 128  ;;  %s987_s0 = smov [#allocation6]  }
  0x5b   : > { %p802_p12 = scmp.ne.s32.totalorder %s1175_s13, %s801_s2  ;;  %s806_s7 = sshll.u32 %s987_s0, 4  ;;  %s807_s7 = int_to_ptr.vmem [resolvable:$false] %s806_s7 }
  0x5c   : > { %s808_s22 = scalar_lea.vmem %s807_s7, 256  ;;  %p809_p4 = scmp.lt.s32.totalorder %s1175_s13, %s807_s7 }
  0x5d   : > { %p804_p6 = pnand %p802_p12, %p788_p13  ;;  %p810_p1 = scmp.lt.s32.totalorder %s808_s22, %s801_s2 }
  0x5f   : > { %p805_p8 = pneg %p804_p6  ;;  %p811_p0 = por %p810_p1, %p809_p4 }
  0x61   : > { %p812_p11 = pnand %p811_p0, %p805_p8 }
  0x63   : > { %815 = shalt.err (!%p812_p11)
}
  0x64   : > { %638 = dma.hbm_to_vmem [thread:$0]  (!%p1161_p3), %s1192_s11, 128, %s1175_s13, %s182_s10  }
  0x65   : > { %s1226_s30 = scalar_select %p1185_p2, %s958_s19, %s86_s26  }
  0x66   : > { %p1438_p4 = scmp.eq.s32.totalorder %s982_s25, 0  ;;  %p1439_p5 = scmp.ne.s32.totalorder %s958_s19, %s954_s18 }
  0x67   : > { %p99_p8 = scmp.ne.s32.totalorder %s954_s18, %s950_s17  ;;  %s202_s29 = sand.u32 1, %s958_s19  }
  0x68   : > { %p95_p10 = por %p1439_p5, %p1438_p4  ;;  %s546_s16 = sshll.u32 %s978_s24, 11 }
  0x69   : > { %p1440_p9 = scmp.ne.s32.totalorder %s1429_s9, 0  ;;  %s532_s2 = sshll.u32 %s202_s29, 7 }
  0x6a   : > { %s1246_s13 = scalar_lea.hbm %s1412_s4, %s546_s16  ;;  %p1442_p3 = scmp.lt.s32.totalorder %s982_s25, 4 }
  0x6b   : > { %p1239_p13 = por %p99_p8, %p1440_p9  ;;  %s206_s9 = scalar_lea.vmem [#allocation9], %s532_s2 }
  0x6c   : > { %p1250_p2 = pnand %p1442_p3, %p95_p10  ;;  %s213_s26 = sshll.u32 %s206_s9, 4  ;;  %s1254_s26 = int_to_ptr.vmem [resolvable:$true] %s213_s26 }
  0x6d   : > { %s1256_s27 = scalar_lea.sflag [#allocation10], %s202_s29  ;;  %s816_s11 = scalar_lea.hbm %s1246_s13, 2048 }
  0x6e   : > { %p817_p7 = scmp.ne.s32.totalorder %s1246_s13, %s816_s11  ;;  %p818_p12 = pneg %p1250_p2 }
  0x6f   : > { %s821_s16 = scalar_lea.hbm %s1412_s4, 8192  ;;  %p822_p0 = scmp.lt.u32.totalorder %s1246_s13, %s1412_s4 }
  0x70   : > { %p819_p6 = pnand %p818_p12, %p817_p7  ;;  %p823_p11 = scmp.lt.u32.totalorder %s821_s16, %s816_s11 }
  0x71   : > { %p825_p5 = scmp.lt.u32.totalorder %s816_s11, %s1246_s13 }
  0x72   : > { %p820_p1 = pneg %p819_p6  ;;  %p824_p4 = por %p823_p11, %p822_p0 }
  0x74   : > { %p826_p10 = por %p825_p5, %p824_p4 }
  0x76   : > { %p827_p8 = pnand %p826_p10, %p820_p1 }
  0x78   : > { %830 = shalt.err (!%p827_p8)
}
  0x79   : > { %s831_s29 = scalar_lea.vmem %s1254_s26, 2048  ;;  %s988_s2 = smov [#allocation9]  }
  0x7a   : > { %p832_p9 = scmp.ne.s32.totalorder %s1254_s26, %s831_s29  ;;  %s836_s9 = sshll.u32 %s988_s2, 4  ;;  %s837_s9 = int_to_ptr.vmem [resolvable:$false] %s836_s9 }
  0x7b   : > { %s838_s10 = scalar_lea.vmem %s837_s9, 4096  ;;  %p839_p6 = scmp.lt.s32.totalorder %s1254_s26, %s837_s9 }
  0x7c   : > { %p834_p3 = pnand %p832_p9, %p818_p12  ;;  %p840_p0 = scmp.lt.s32.totalorder %s838_s10, %s831_s29 }
  0x7e   : > { %p835_p7 = pneg %p834_p3  ;;  %p841_p11 = por %p840_p0, %p839_p6 }
  0x80   : > { %p842_p4 = pnand %p841_p11, %p835_p7 }
  0x82   : > { %845 = shalt.err (!%p842_p4)
}
  0x83   : > { %s989_s11 = smov 128   ;;  %s990_s22 = smov 8  }
  0x84   : > { %641 = dma.hbm_to_vmem [thread:$0]  (!%p1250_p2), %s1246_s13, 2048, %s1254_s26, %s1256_s27, %s989_s11, %s989_s11, %s990_s22  }
  0x85   : > { %p1444_p12 = scmp.ne.s32.totalorder %s1436_s20, 0 }
  0x86   : > { %s235_s16 = sand.u32 (!%p1444_p12), 1, %s966_s21   ;;  %p1445_p1 = scmp.ne.s32.totalorder (!%p1444_p12), %s1430_s12, 0 }
  0x87   : > { %233 = sbr.rel (%p1444_p12) target bundleno = 433 (0x1b1), region = 32  ;;  %s1287_s0 = sshll.u32 (!%p1444_p12), %s235_s16, 3 }
  0x88   : > { %s236_s7 = scalar_lea.sflag (!%p1444_p12), [#allocation7], %s235_s16  ;;  %s239_s29 = scalar_lea.vmem (!%p1444_p12), [#allocation6], %s1287_s0 }
  0x8e   : > { %925 = dma.done.wait (%p1445_p1), %s236_s7, 128  }
  0x8f   : > { %927 = vsyncadd (%p1445_p1), %s236_s7, 4294967168  ;;  %s244_s17 = sand.u32 1, %s954_s18  }
  0x90   : > { %s537_s13 = sshll.u32 %s244_s17, 7  ;;  %s245_s26 = scalar_lea.sflag [#allocation10], %s244_s17 }
  0x91   : > { %s1295_s20 = scalar_lea.vmem [#allocation9], %s537_s13 }
  0x92   : > { %929 = dma.done.wait (%p1239_p13), %s245_s26, 2048  }
  0x93   : > { %931 = vsyncadd (%p1239_p13), %s245_s26, 4294965248  ;;  %s277_s12 = sand.u32 1, %s942_s15   ;;  %s281_s27 = sld [smem:[#allocation3 + %s974_s23]]  ;;  %v991_v0 = vmov 0.0|0.0   ;;  %vm992_vm0 = vmmov 0   ;;  %v993_v1 = vmov 0.0  }
  0x94   : > { %s1304_s2 = sld [smem:[#allocation5 + %s974_s23]]  ;;  %599 = vmatprep.subr.bf16.mxu0 %v991_v0  ;;  %596 = vmatprep.mubr.msk.f32.mxu0 %vm992_vm0, %v993_v1  ;;  %s1308_s8 = sshll.u32 %s277_s12, 3  ;;  %v288_v2 = vld [vmem:[%s1295_s20] sm:$0xff]  ;;  %v289_v3 = vld [vmem:[%s1295_s20 + $0x8] sm:$0xff]  ;;  %v290_v4 = vld [vmem:[%s1295_s20 + $0x10] sm:$0xff] }
  0x95   : > { %v600_v5 = vpack.c.bf16 %v289_v3, %v288_v2  ;;  %v291_v6 = vld [vmem:[%s1295_s20 + $0x18] sm:$0xff]  ;;  %v292_v8 = vld [vmem:[%s1295_s20 + $0x20] sm:$0xff]  ;;  %v293_v9 = vld [vmem:[%s1295_s20 + $0x28] sm:$0xff]  ;;  %s279_s22 = scalar_lea.vmem [#allocation11], %s1308_s8 }
  0x96   : > { %v603_v7 = vpack.c.bf16 %v291_v6, %v290_v4  ;;  %v606_v10 = vpack.c.bf16 %v293_v9, %v292_v8  ;;  %v294_v11 = vld [vmem:[%s1295_s20 + $0x30] sm:$0xff]  ;;  %v295_v12 = vld [vmem:[%s1295_s20 + $0x38] sm:$0xff]  ;;  %v296_v14 = vld [vmem:[%s1295_s20 + $0x40] sm:$0xff] }
  0x97   : > { %601 = vmatpush3.bf16.msra.mxu0 %v600_v5  ;;  %v609_v13 = vpack.c.bf16 %v295_v12, %v294_v11  ;;  %v297_v15 = vld [vmem:[%s1295_s20 + $0x48] sm:$0xff]  ;;  %v298_v17 = vld [vmem:[%s1295_s20 + $0x50] sm:$0xff]  ;;  %v299_v18 = vld [vmem:[%s1295_s20 + $0x58] sm:$0xff] }
  0x98   : > { %602 = vmatprep.subr.bf16.mxu0 %v991_v0  ;;  %v612_v16 = vpack.c.bf16 %v297_v15, %v296_v14  ;;  %v615_v19 = vpack.c.bf16 %v299_v18, %v298_v17  ;;  %v300_v20 = vld [vmem:[%s1295_s20 + $0x60] sm:$0xff]  ;;  %v301_v21 = vld [vmem:[%s1295_s20 + $0x68] sm:$0xff]  ;;  %v302_v23 = vld [vmem:[%s1295_s20 + $0x70] sm:$0xff] }
  0x99   : > { %p282_p13 = scmp.lt.s32.totalorder %s281_s27, 2  ;;  %v618_v22 = vpack.c.bf16 %v301_v21, %v300_v20  ;;  %v303_v24 = vld [vmem:[%s1295_s20 + $0x78] sm:$0xff] }
  0x9a   : > { %v621_v25 = vpack.c.bf16 %v303_v24, %v302_v23  ;;  %v287_v26 = vld [vmem:[%s239_s29] sm:$0xff]  ;;  %p539_p2 = scmp.ne.s32.totalorder %s1304_s2, 1 }
  0x9b   : > { %s1469_s27 = smov (!%p282_p13, %s281_s27), 2  ;;  %604 = vmatpush3.bf16.msra.mxu0 %v603_v7 }
  0x9c   : > { %s284_s11 = scalar_lea.vmem %s1413_s5, %s1469_s27  ;;  %605 = vmatprep.subr.bf16.mxu0 %v991_v0 }
  0x9d   : > { %v540_v29 = vld [vmem:[%s284_s11] ss:$0 sm:$0xff] (!%p539_p2) }
  0x9f   : > { %607 = vmatpush3.bf16.msra.mxu0 %v606_v10 }
  0xa0   : > { %608 = vmatprep.subr.bf16.mxu0 %v991_v0 }
  0xa3   : > { %610 = vmatpush3.bf16.msra.mxu0 %v609_v13 }
  0xa4   : > { %611 = vmatprep.subr.bf16.mxu0 %v991_v0 }
  0xa7   : > { %613 = vmatpush3.bf16.msra.mxu0 %v612_v16 }
  0xa8   : > { %614 = vmatprep.subr.bf16.mxu0 %v991_v0 }
  0xab   : > { %616 = vmatpush3.bf16.msra.mxu0 %v615_v19 }
  0xac   : > { %617 = vmatprep.subr.bf16.mxu0 %v991_v0 }
  0xaf   : > { %619 = vmatpush3.bf16.msra.mxu0 %v618_v22 }
  0xb0   : > { %620 = vmatprep.subr.bf16.mxu0 %v991_v0 }
  0xb3   : > { %622 = vmatpush3.bf16.msra.mxu0 %v621_v25 }
  0xb6   : > { %597 = vmatmul.mubr.f32.vlgmr.msra.gmra.mrb[0].mxu0 %v287_v26 }
 0x184   : > { %378 = sbr.rel (%p539_p2) target bundleno = 397 (0x18d), region = 44 }
 0x189   : > { %v370_v27 = vpop.f32.mrb[0].mxu0 }
 0x18a   : > { %v598_v28 = vpop.f32.mrb[1].mxu0  ;;  %v386_v30 = vadd.f32 (!%p539_p2), %v540_v29, %v370_v27 }
 0x18c   : > { %387 = vst [vmem:[%s279_s22] sm:$0xff] %v386_v30 }
 0x18d PF: > { %p541_p5 = scmp.eq.s32.totalorder %s1304_s2, 1 }
 0x18f   : > { %391 = sbr.rel (%p541_p5) target bundleno = 407 (0x197), region = 48 }
 0x193   : > { %v392_v31 = vld [vmem:[%s279_s22] sm:$0xff] (!%p541_p5) }
 0x194   : > { %v393_v32 = vadd.f32 (!%p541_p5), %v392_v31, %v370_v27 }
 0x196   : > { %394 = vst [vmem:[%s279_s22] sm:$0xff] %v393_v32 }
 0x197 PF: > { %p1446_p10 = scmp.ne.s32.totalorder %s1431_s14, 0  ;;  %s412_s17 = sshll.u32 %s279_s22, 4  ;;  %s1347_s17 = int_to_ptr.vmem [resolvable:$true] %s412_s17 }
 0x198   : > { %s396_s2 = scalar_lea.sflag [#allocation8], %s277_s12  ;;  %s846_s8 = scalar_lea.vmem %s1347_s17, 128 }
 0x199   : > { %s629_s0 = scalar_select %p1446_p10, [#allocation3], [#allocation13] }
 0x19a   : > { %s1471_s23 = smov (!%p1446_p10, %s974_s23), 0  ;;  %p847_p8 = scmp.ne.s32.totalorder %s1347_s17, %s846_s8 }
 0x19b   : > { %s403_s29 = sld [smem:[%s629_s0 + %s1471_s23]]  ;;  %s994_s9 = smov [#allocation11]  }
 0x19c   : > { %p848_p9 = pnand %p847_p8, %p1446_p10  ;;  %s850_s23 = sshll.u32 %s994_s9, 4  ;;  %s851_s23 = int_to_ptr.vmem [resolvable:$false] %s850_s23 }
 0x19d   : > { %s852_s10 = scalar_lea.vmem %s851_s23, 256  ;;  %p853_p7 = scmp.lt.s32.totalorder %s1347_s17, %s851_s23 }
 0x19e   : > { %p849_p3 = pneg %p848_p9  ;;  %p854_p6 = scmp.lt.s32.totalorder %s852_s10, %s846_s8 }
 0x1a0   : > { %p855_p0 = por %p854_p6, %p853_p7 }
 0x1a1   : > { %s543_s13 = sshll.u32 %s403_s29, 7 }
 0x1a2   : > { %s410_s27 = scalar_lea.hbm %s1414_s6, %s543_s13  ;;  %p856_p11 = pnand %p855_p0, %p849_p3 }
 0x1a4   : > { %859 = shalt.err (!%p856_p11)
}
 0x1a5   : > { %s860_s11 = scalar_lea.hbm %s410_s27, 128  ;;  %s864_s16 = scalar_lea.hbm %s1414_s6, 384 }
 0x1a6   : > { %p861_p4 = scmp.ne.s32.totalorder %s410_s27, %s860_s11  ;;  %p865_p13 = scmp.lt.u32.totalorder %s410_s27, %s1414_s6 }
 0x1a7   : > { %p866_p2 = scmp.lt.u32.totalorder %s864_s16, %s860_s11  ;;  %p868_p8 = scmp.lt.u32.totalorder %s860_s11, %s410_s27 }
 0x1a8   : > { %p862_p12 = pnand %p861_p4, %p1446_p10 }
 0x1a9   : > { %p867_p5 = por %p866_p2, %p865_p13 }
 0x1aa   : > { %p863_p1 = pneg %p862_p12 }
 0x1ab   : > { %p869_p9 = por %p868_p8, %p867_p5 }
 0x1ad   : > { %p870_p3 = pnand %p869_p9, %p863_p1 }
 0x1af   : > { %873 = shalt.err (!%p870_p3)
}
 0x1b0   : > { %631 = dma.vmem_to_hbm [thread:$0]  (%p1446_p10), %s1347_s17, 128, %s410_s27, %s396_s2  }
 0x1b1 PF: > { %s1447_s29 = sld [smem:[#allocation19_spill]]  ;;  %p647_p7 = scmp.ge.s32.totalorder %s982_s25, 2 }
 0x1b2   : > { %p1448_p6 = scmp.ne.s32.totalorder %s1432_s1, 0 }
 0x1b4   : > { %p643_p0 = pnand %p647_p7, %p1448_p6 }
 0x1b7   : > { %s424_s13 = sand.u32 1, %s1447_s29  }
 0x1b8   : > { %s425_s26 = scalar_lea.sflag [#allocation8], %s424_s13 }
 0x1b9   : > { %933 = dma.done.wait (!%p643_p0), %s425_s26, 128  }
 0x1ba   : > { %935 = vsyncadd (!%p643_p0), %s425_s26, 4294967168  ;;  %s37_s25 = sadd.s32 1, %s982_s25   ;;  %s1449_s20 = sld [smem:[#allocation20_spill]] }
 0x1bb   : > { %p34_p11 = scmp.ge.s32.totalorder %s37_s25, 6   ;;  %s1450_s16 = sld [smem:[#allocation23_spill]] }
 0x1bc   : > { %s1451_s14 = sld [smem:[#allocation21_spill]]  ;;  %s1452_s22 = sld [smem:[#allocation22_spill]] }
 0x1bd   : > { %s1453_s2 = smov %s942_s15  ;;  %s1455_s17 = smov %s954_s18 }
 0x1be   : > { %s1456_s18 = smov %s958_s19  ;;  %s1457_s19 = smov %s1226_s30 }
 0x1bf   : > { %s1460_s23 = smov %s978_s24  ;;  %s1461_s24 = smov %s1463_s28 }
 0x1c0   : > { %s1454_s15 = smov %s1449_s20  ;;  %s1458_s20 = smov %s966_s21 }
 0x1c1   :  { %36 = sbr.rel (!%p34_p11) target bundleno = 44 (0x2c), region = 101 }
 0x1c2   : > { %s1459_s21 = smov %s1451_s14 }
 0x1c8   :  { %430 = vsyncpa [#allocation7], 1 }
 0x1c9   :  { %432 = vsyncpa [#allocation7 + $0x1], 1 }
 0x1ca   :  { %433 = vsyncpa [#allocation10], 1 }
 0x1cb   :  { %435 = vsyncpa [#allocation10 + $0x1], 1 }
 0x1cc   :  { %436 = vsyncpa [#allocation8], 1 }
 0x1cd   :  { %438 = vsyncpa [#allocation8 + $0x1], 1 }

</bundles_post_ra>
